<compile_context>
chip_gen: v6e
topology: v6e:2x2x1
jax: 0.10.0
libtpu: 0.0.40
codegen_flags: <defaults>
</compile_context>

<pallas_src>
import functools

import jax
import jax.numpy as jnp
from jax.experimental import pallas as pl
from jax.experimental.pallas import tpu as pltpu

LANE = 128  # lane width; padded hidden-feature dim


def _round_up(n, m):
    return ((n + m - 1) // m) * m


def _pad2d(a, rows, cols):
    """Zero-pad a 2-D array up to (rows, cols).  Padding MUST be exact zeros:
    padded hidden lanes then stay 0 through relu/fc2/fc3."""
    out = jnp.zeros((rows, cols), a.dtype)
    return out.at[: a.shape[0], : a.shape[1]].set(a)


def qnetwork_kernel(x_ref, w1_ref, b1_ref, w2_ref, b2_ref, w3_ref, b3_ref, o_ref):
    x = x_ref[...]          # (TB, state_size)   f32
    w1 = w1_ref[...]        # (state_size, 128)  f32, real 4x24 zero-padded

    # fc1 (K = state_size = 4): VPU broadcast-FMAs, keeps the MXU free.
    h1 = b1_ref[...]
    for k in range(x.shape[1]):                 # unrolled at trace time (4 iters)
        h1 = h1 + x[:, k:k + 1] * w1[k:k + 1, :]
    h1 = jnp.maximum(h1, 0.0)                   # (TB, 128); padded lanes stay 0

    # fc2 / fc3 on the MXU with f32 accumulation.  Weights may be bf16
    # (v5e fast path); activations are cast to match, accumulation stays f32.
    h2 = jnp.dot(h1.astype(w2_ref.dtype), w2_ref[...],
                 preferred_element_type=jnp.float32) + b2_ref[...]
    h2 = jnp.maximum(h2, 0.0)                   # (TB, 128)

    out = jnp.dot(h2.astype(w3_ref.dtype), w3_ref[...],
                  preferred_element_type=jnp.float32) + b3_ref[...]   # (TB, 128)

    # Slim store: only the real action_size lanes leave VMEM (masked vst; the
    # HBM writeback DMA is contiguous since the block spans the full last dim).
    o_ref[...] = out[:, : o_ref.shape[1]].astype(o_ref.dtype)


@functools.partial(jax.jit, static_argnames=("block_b", "use_bf16"))
def qnetwork_forward(x, params, *, block_b=2048, use_bf16=False):
    """x: (B, state_size) float32; params: dict of w1,b1,w2,b2,w3,b3 (PyTorch-transposed)."""
    w1, b1, w2, b2, w3, b3 = (params[k] for k in ("w1", "b1", "w2", "b2", "w3", "b3"))
    batch, state_size = x.shape
    h1_dim, h2_dim = w1.shape[1], w2.shape[1]
    action_size = w3.shape[1]

    # Batch tile: multiple of 8, capped at block_b.  For non-trivial batches
    # keep at least two grid steps so both v7x TensorCores get work on the
    # "parallel" batch axis (no-op on single-TC v5e/v6e).
    b8 = _round_up(batch, 8)
    tb = max(8, min(block_b, b8))
    if b8 >= 512 and tb > b8 // 2:
        tb = _round_up(b8 // 2, 8)
    b_pad = _round_up(batch, tb)

    # Fast path: skip the padding copy of x when the grid divides the batch evenly.
    x_p = x if b_pad == batch else jnp.zeros((b_pad, state_size), x.dtype).at[:batch, :].set(x)

    # One-time padding of the tiny weights to lane-friendly shapes.
    mm_dtype = jnp.bfloat16 if use_bf16 else jnp.float32
    w1p = _pad2d(w1, state_size, LANE)                 # (4, 128)   f32
    b1p = _pad2d(b1, 1, LANE)                          # (1, 128)   f32
    w2p = _pad2d(w2, LANE, LANE).astype(mm_dtype)      # (128, 128), real (24, 48)
    b2p = _pad2d(b2, 1, LANE)                          # (1, 128)   f32
    w3p = _pad2d(w3, LANE, LANE).astype(mm_dtype)      # (128, 128), real (48, 2)
    b3p = _pad2d(b3, 1, LANE)                          # (1, 128)   f32

    grid = (b_pad // tb,)
    const = lambda i: (0, 0)   # weights/biases: same block every step (VMEM-resident)

    flops = 2 * b_pad * (state_size * h1_dim + h1_dim * h2_dim + h2_dim * action_size)
    bytes_accessed = (
        b_pad * state_size * 4                                # x read
        + b_pad * action_size * 4                             # q write (slim)
        + (w1p.size + b1p.size + b2p.size + b3p.size) * 4
        + (w2p.size + w3p.size) * w2p.dtype.itemsize
    )

    out = pl.pallas_call(
        qnetwork_kernel,
        out_shape=jax.ShapeDtypeStruct((b_pad, action_size), jnp.float32),
        grid=grid,
        in_specs=[
            pl.BlockSpec((tb, state_size), lambda i: (i, 0)),   # x: tiled over batch
            pl.BlockSpec((state_size, LANE), const),            # w1
            pl.BlockSpec((1, LANE), const),                     # b1
            pl.BlockSpec((LANE, LANE), const),                  # w2
            pl.BlockSpec((1, LANE), const),                     # b2
            pl.BlockSpec((LANE, LANE), const),                  # w3
            pl.BlockSpec((1, LANE), const),                     # b3
        ],
        out_specs=pl.BlockSpec((tb, action_size), lambda i: (i, 0)),   # slim Q output
        compiler_params=pltpu.CompilerParams(
            dimension_semantics=("parallel",),                  # v7x: shard batch over 2 TCs
        ),
        cost_estimate=pl.CostEstimate(
            flops=flops, transcendentals=0, bytes_accessed=bytes_accessed
        ),
    )(x_p, w1p, b1p, w2p, b2p, w3p, b3p)

    return out[:batch, :]


def init_params(key, state_size=4, action_size=2):
    """Deterministic init mimicking nn.Linear's U(-1/sqrt(fan_in), 1/sqrt(fan_in))."""
    def linear(key, fan_in, fan_out):
        kw, kb = jax.random.split(key)
        bound = 1.0 / jnp.sqrt(fan_in)
        w = jax.random.uniform(kw, (fan_in, fan_out), jnp.float32, -bound, bound)
        b = jax.random.uniform(kb, (1, fan_out), jnp.float32, -bound, bound)
        return w, b

    k1, k2, k3 = jax.random.split(key, 3)
    w1, b1 = linear(k1, state_size, 24)
    w2, b2 = linear(k2, 24, 48)
    w3, b3 = linear(k3, 48, action_size)
    return {"w1": w1, "b1": b1, "w2": w2, "b2": b2, "w3": w3, "b3": b3}


def qnetwork_reference(x, p):
    h1 = jnp.maximum(x @ p["w1"] + p["b1"], 0.0)
    h2 = jnp.maximum(h1 @ p["w2"] + p["b2"], 0.0)
    return h2 @ p["w3"] + p["b3"]


if __name__ == "__main__":
    key = jax.random.PRNGKey(0)
    k_params, k_x1, k_x2, k_x3 = jax.random.split(key, 4)

    state_size, action_size = 4, 2  # CartPole-v1: obs dim 4, 2 actions
    params = init_params(k_params, state_size, action_size)

    # 1) Tiny acting batch (single grid step, fast path, slim output).
    x = jax.random.normal(k_x1, (8, state_size), jnp.float32)
    out = jax.block_until_ready(qnetwork_forward(x, params))
    ref = qnetwork_reference(x, params)
    assert out.shape == (8, action_size)
    assert jnp.allclose(out, ref, atol=1e-5, rtol=1e-5), "mismatch (batch=8)"

    # 2) Multi-tile grid with a batch that doesn't divide the tile (padding path).
    x2 = jax.random.normal(k_x2, (200, state_size), jnp.float32)
    out2 = jax.block_until_ready(qnetwork_forward(x2, params, block_b=64))
    ref2 = qnetwork_reference(x2, params)
    assert out2.shape == (200, action_size)
    assert jnp.allclose(out2, ref2, atol=1e-5, rtol=1e-5), "mismatch (batch=200)"

    # 3) Training-size batch: exercises the >=2-step grid split (v7x megacore)
    #    and the no-copy fast path.
    x3 = jax.random.normal(k_x3, (1024, state_size), jnp.float32)
    out3 = jax.block_until_ready(qnetwork_forward(x3, params))
    ref3 = qnetwork_reference(x3, params)
    assert out3.shape == (1024, action_size)
    assert jnp.allclose(out3, ref3, atol=1e-5, rtol=1e-5), "mismatch (batch=1024)"

    # 4) bf16-MXU fast path (v5e critical-path fix); looser tolerance, argmax-safe for DQN.
    out4 = jax.block_until_ready(qnetwork_forward(x3, params, use_bf16=True))
    assert out4.shape == (1024, action_size)
    assert float(jnp.max(jnp.abs(out4 - ref3))) < 5e-2, "mismatch (bf16 path)"

    print("KERNEL_OK")
</pallas_src>

<mosaic_0001>
module attributes {stable_mosaic.version = 11 : i64} {
  func.func @qnetwork_kernel(%arg0: i32, %arg1: memref<8x4xf32, #tpu.memory_space<vmem>>, %arg2: memref<4x128xf32, #tpu.memory_space<vmem>>, %arg3: memref<1x128xf32, #tpu.memory_space<vmem>>, %arg4: memref<128x128xf32, #tpu.memory_space<vmem>>, %arg5: memref<1x128xf32, #tpu.memory_space<vmem>>, %arg6: memref<128x128xf32, #tpu.memory_space<vmem>>, %arg7: memref<1x128xf32, #tpu.memory_space<vmem>>, %arg8: memref<8x2xf32, #tpu.memory_space<vmem>>) attributes {dimension_semantics = [#tpu.dimension_semantics<parallel>], iteration_bounds = array<i64: 1>, scalar_prefetch = 0 : i64, scratch_operands = 0 : i64, tpu.core_type = #tpu.core_type<tc>, window_params = [{transform_indices = @transform_0, window_bounds = array<i64: 8, 4>}, {pipeline_mode = #tpu.pipeline_mode<synchronous>, transform_indices = @transform_1, window_bounds = array<i64: 4, 128>}, {pipeline_mode = #tpu.pipeline_mode<synchronous>, transform_indices = @transform_2, window_bounds = array<i64: 1, 128>}, {pipeline_mode = #tpu.pipeline_mode<synchronous>, transform_indices = @transform_3, window_bounds = array<i64: 128, 128>}, {pipeline_mode = #tpu.pipeline_mode<synchronous>, transform_indices = @transform_4, window_bounds = array<i64: 1, 128>}, {pipeline_mode = #tpu.pipeline_mode<synchronous>, transform_indices = @transform_5, window_bounds = array<i64: 128, 128>}, {pipeline_mode = #tpu.pipeline_mode<synchronous>, transform_indices = @transform_6, window_bounds = array<i64: 1, 128>}, {transform_indices = @transform_7, window_bounds = array<i64: 8, 2>}]} {
    %c0 = arith.constant 0 : index
    %c0_0 = arith.constant 0 : index
    %0 = vector.load %arg1[%c0, %c0_0] : memref<8x4xf32, #tpu.memory_space<vmem>>, vector<8x4xf32>
    %c0_1 = arith.constant 0 : index
    %c0_2 = arith.constant 0 : index
    %1 = vector.load %arg2[%c0_1, %c0_2] : memref<4x128xf32, #tpu.memory_space<vmem>>, vector<4x128xf32>
    %c0_3 = arith.constant 0 : index
    %c0_4 = arith.constant 0 : index
    %2 = vector.load %arg3[%c0_3, %c0_4] : memref<1x128xf32, #tpu.memory_space<vmem>>, vector<1x128xf32>
    %3 = vector.extract_strided_slice %0 {offsets = [0, 0], sizes = [8, 1], strides = [1, 1]} : vector<8x4xf32> to vector<8x1xf32>
    %4 = vector.extract_strided_slice %1 {offsets = [0, 0], sizes = [1, 128], strides = [1, 1]} : vector<4x128xf32> to vector<1x128xf32>
    %5 = vector.broadcast %3 : vector<8x1xf32> to vector<8x128xf32>
    %6 = vector.broadcast %4 : vector<1x128xf32> to vector<8x128xf32>
    %7 = arith.mulf %5, %6 : vector<8x128xf32>
    %8 = vector.broadcast %2 : vector<1x128xf32> to vector<8x128xf32>
    %9 = arith.addf %8, %7 : vector<8x128xf32>
    %10 = vector.extract_strided_slice %0 {offsets = [0, 1], sizes = [8, 1], strides = [1, 1]} : vector<8x4xf32> to vector<8x1xf32>
    %11 = vector.extract_strided_slice %1 {offsets = [1, 0], sizes = [1, 128], strides = [1, 1]} : vector<4x128xf32> to vector<1x128xf32>
    %12 = vector.broadcast %10 : vector<8x1xf32> to vector<8x128xf32>
    %13 = vector.broadcast %11 : vector<1x128xf32> to vector<8x128xf32>
    %14 = arith.mulf %12, %13 : vector<8x128xf32>
    %15 = arith.addf %9, %14 : vector<8x128xf32>
    %16 = vector.extract_strided_slice %0 {offsets = [0, 2], sizes = [8, 1], strides = [1, 1]} : vector<8x4xf32> to vector<8x1xf32>
    %17 = vector.extract_strided_slice %1 {offsets = [2, 0], sizes = [1, 128], strides = [1, 1]} : vector<4x128xf32> to vector<1x128xf32>
    %18 = vector.broadcast %16 : vector<8x1xf32> to vector<8x128xf32>
    %19 = vector.broadcast %17 : vector<1x128xf32> to vector<8x128xf32>
    %20 = arith.mulf %18, %19 : vector<8x128xf32>
    %21 = arith.addf %15, %20 : vector<8x128xf32>
    %22 = vector.extract_strided_slice %0 {offsets = [0, 3], sizes = [8, 1], strides = [1, 1]} : vector<8x4xf32> to vector<8x1xf32>
    %23 = vector.extract_strided_slice %1 {offsets = [3, 0], sizes = [1, 128], strides = [1, 1]} : vector<4x128xf32> to vector<1x128xf32>
    %24 = vector.broadcast %22 : vector<8x1xf32> to vector<8x128xf32>
    %25 = vector.broadcast %23 : vector<1x128xf32> to vector<8x128xf32>
    %26 = arith.mulf %24, %25 : vector<8x128xf32>
    %27 = arith.addf %21, %26 : vector<8x128xf32>
    %cst = arith.constant 0.000000e+00 : f32
    %28 = vector.broadcast %cst : f32 to vector<8x128xf32>
    %29 = arith.maximumf %27, %28 : vector<8x128xf32>
    %c0_5 = arith.constant 0 : index
    %c0_6 = arith.constant 0 : index
    %30 = vector.load %arg4[%c0_5, %c0_6] : memref<128x128xf32, #tpu.memory_space<vmem>>, vector<128x128xf32>
    %cst_7 = arith.constant dense<0.000000e+00> : vector<8x128xf32>
    %31 = tpu.matmul %29, %30, %cst_7 {dimension_numbers = #tpu.dot_dimension_numbers<[1], [0], [0], [1], [0, 0, 1, 1], [], []>} : vector<8x128xf32>, vector<128x128xf32>, vector<8x128xf32> -> vector<8x128xf32>
    %c0_8 = arith.constant 0 : index
    %c0_9 = arith.constant 0 : index
    %32 = vector.load %arg5[%c0_8, %c0_9] : memref<1x128xf32, #tpu.memory_space<vmem>>, vector<1x128xf32>
    %33 = vector.broadcast %32 : vector<1x128xf32> to vector<8x128xf32>
    %34 = arith.addf %31, %33 : vector<8x128xf32>
    %cst_10 = arith.constant 0.000000e+00 : f32
    %35 = vector.broadcast %cst_10 : f32 to vector<8x128xf32>
    %36 = arith.maximumf %34, %35 : vector<8x128xf32>
    %c0_11 = arith.constant 0 : index
    %c0_12 = arith.constant 0 : index
    %37 = vector.load %arg6[%c0_11, %c0_12] : memref<128x128xf32, #tpu.memory_space<vmem>>, vector<128x128xf32>
    %cst_13 = arith.constant dense<0.000000e+00> : vector<8x128xf32>
    %38 = tpu.matmul %36, %37, %cst_13 {dimension_numbers = #tpu.dot_dimension_numbers<[1], [0], [0], [1], [0, 0, 1, 1], [], []>} : vector<8x128xf32>, vector<128x128xf32>, vector<8x128xf32> -> vector<8x128xf32>
    %c0_14 = arith.constant 0 : index
    %c0_15 = arith.constant 0 : index
    %39 = vector.load %arg7[%c0_14, %c0_15] : memref<1x128xf32, #tpu.memory_space<vmem>>, vector<1x128xf32>
    %40 = vector.broadcast %39 : vector<1x128xf32> to vector<8x128xf32>
    %41 = arith.addf %38, %40 : vector<8x128xf32>
    %42 = vector.extract_strided_slice %41 {offsets = [0, 0], sizes = [8, 2], strides = [1, 1]} : vector<8x128xf32> to vector<8x2xf32>
    %c0_16 = arith.constant 0 : index
    %c0_17 = arith.constant 0 : index
    %43 = vector.load %arg8[%c0_16, %c0_17] : memref<8x2xf32, #tpu.memory_space<vmem>>, vector<8x2xf32>
    tpu.vector_store %arg8[%c0_16, %c0_17], %42 {strides = array<i32>} : memref<8x2xf32, #tpu.memory_space<vmem>>, vector<8x2xf32>,
    return
  }
  func.func @transform_0(%arg0: i32) -> (i32, i32) {
    %c0_i32 = arith.constant 0 : i32
    %c0_i32_0 = arith.constant 0 : i32
    return %arg0, %c0_i32 : i32, i32
  }
  func.func @transform_1(%arg0: i32) -> (i32, i32) {
    %c0_i32 = arith.constant 0 : i32
    %c0_i32_0 = arith.constant 0 : i32
    %c0_i32_1 = arith.constant 0 : i32
    return %c0_i32, %c0_i32_0 : i32, i32
  }
  func.func @transform_2(%arg0: i32) -> (i32, i32) {
    %c0_i32 = arith.constant 0 : i32
    %c0_i32_0 = arith.constant 0 : i32
    %c0_i32_1 = arith.constant 0 : i32
    return %c0_i32, %c0_i32_0 : i32, i32
  }
  func.func @transform_3(%arg0: i32) -> (i32, i32) {
    %c0_i32 = arith.constant 0 : i32
    %c0_i32_0 = arith.constant 0 : i32
    %c0_i32_1 = arith.constant 0 : i32
    return %c0_i32, %c0_i32_0 : i32, i32
  }
  func.func @transform_4(%arg0: i32) -> (i32, i32) {
    %c0_i32 = arith.constant 0 : i32
    %c0_i32_0 = arith.constant 0 : i32
    %c0_i32_1 = arith.constant 0 : i32
    return %c0_i32, %c0_i32_0 : i32, i32
  }
  func.func @transform_5(%arg0: i32) -> (i32, i32) {
    %c0_i32 = arith.constant 0 : i32
    %c0_i32_0 = arith.constant 0 : i32
    %c0_i32_1 = arith.constant 0 : i32
    return %c0_i32, %c0_i32_0 : i32, i32
  }
  func.func @transform_6(%arg0: i32) -> (i32, i32) {
    %c0_i32 = arith.constant 0 : i32
    %c0_i32_0 = arith.constant 0 : i32
    %c0_i32_1 = arith.constant 0 : i32
    return %c0_i32, %c0_i32_0 : i32, i32
  }
  func.func @transform_7(%arg0: i32) -> (i32, i32) {
    %c0_i32 = arith.constant 0 : i32
    %c0_i32_0 = arith.constant 0 : i32
    return %arg0, %c0_i32 : i32, i32
  }
}

</mosaic_0001>

<bundles_post_ra>
// kernel: qnetwork_forward.1
= control target key start
LH: loop header
LB: loop body
LE: loop exit
PB: predicated region body
PF: predicated region fallthrough
CT: control target
= control target key end

     0   :  { %v388_v0 = vmov 0   ;;  %v389_v2 = vmov 2   ;;  %v390_v4 = vmov 0.0   ;;  %v391_v6 = vmov 1   ;;  %s582_s0 = inlined_call_operand.vmem [shape: f32[8,4], index: 0, kind: input, shape index: {}]   ;;  %s583_s3 = inlined_call_operand.vmem [shape: f32[128,128], index: 3, kind: input, shape index: {}]   ;;  %s584_s5 = inlined_call_operand.vmem [shape: f32[128,128], index: 5, kind: input, shape index: {}]   ;;  %s585_s1 = inlined_call_operand.vmem [shape: f32[4,128], index: 1, kind: input, shape index: {}]   ;;  %s586_s2 = inlined_call_operand.vmem [shape: f32[1,128], index: 2, kind: input, shape index: {}]   ;;  %s587_s4 = inlined_call_operand.vmem [shape: f32[1,128], index: 4, kind: input, shape index: {}]   ;;  %s588_s6 = inlined_call_operand.vmem [shape: f32[1,128], index: 6, kind: input, shape index: {}]   ;;  %s589_s7 = inlined_call_operand.vmem [shape: f32[8,2], index: 7, kind: output, shape index: {}]  }
   0x1   :  { %383 = vset.pattern.permute.xlu0 %v388_v0  ;;  %v26_v1 = vld [vmem:[%s582_s0] sm:$0xff]  ;;  %385 = vset.pattern.permute.xlu1 %v389_v2  ;;  %v92_v3 = vld [vmem:[%s583_s3 + $0x78] sm:$0xff]  ;;  %v91_v5 = vld [vmem:[%s583_s3 + $0x70] sm:$0xff]  ;;  %v392_v7 = vmov 3   ;;  %vm393_vm0 = vmmov 0   ;;  %v34_v35 = vlaneseq  ;;  %vm264_vm1 = vcmask 15360  }
   0x2   :  { %31 = vperm.xlu0 %383, %v26_v1   ;;  %57 = vperm.xlu1 %385, %v26_v1   ;;  %v90_v8 = vld [vmem:[%s583_s3 + $0x68] sm:$0xff]  ;;  %v89_v9 = vld [vmem:[%s583_s3 + $0x60] sm:$0xff]  ;;  %v88_v10 = vld [vmem:[%s583_s3 + $0x58] sm:$0xff] }
   0x3   :  { %307 = vmatprep.subr.mxu0 %v390_v4  ;;  %342 = vmatprep.subr.mxu1 %v390_v4  ;;  %v87_v11 = vld [vmem:[%s583_s3 + $0x50] sm:$0xff]  ;;  %v186_v12 = vld [vmem:[%s584_s5 + $0x78] sm:$0xff]  ;;  %v86_v14 = vld [vmem:[%s583_s3 + $0x48] sm:$0xff]  ;;  %v35_v36 = vshrl.u32 %v34_v35, 7 }
   0x4   :  { %308 = vmatpush3.msra.mxu0 %v92_v3  ;;  %339 = vmatprep.mubr.msk.f32.mxu0 %vm393_vm0, %v390_v4  ;;  %v185_v13 = vld [vmem:[%s584_s5 + $0x70] sm:$0xff]  ;;  %v184_v15 = vld [vmem:[%s584_s5 + $0x68] sm:$0xff]  ;;  %v85_v16 = vld [vmem:[%s583_s3 + $0x40] sm:$0xff] }
   0x5   :  { %309 = vmatprep.subr.mxu0 %v390_v4  ;;  %374 = vmatprep.mubr.msk.f32.mxu1 %vm393_vm0, %v390_v4  ;;  %v183_v17 = vld [vmem:[%s584_s5 + $0x60] sm:$0xff]  ;;  %v84_v18 = vld [vmem:[%s583_s3 + $0x38] sm:$0xff]  ;;  %v83_v20 = vld [vmem:[%s583_s3 + $0x30] sm:$0xff]  ;;  %v36_v37 = vsub.s32 0, %v35_v36  ;;  %v52_v40 = vsub.s32 1, %v35_v36  ;;  %v62_v42 = vsub.s32 2, %v35_v36 }
   0x6   :  { %384 = vset.pattern.permute.xlu0 %v391_v6  ;;  %386 = vset.pattern.permute.xlu1 %v392_v7  ;;  %v182_v19 = vld [vmem:[%s584_s5 + $0x58] sm:$0xff]  ;;  %v181_v21 = vld [vmem:[%s584_s5 + $0x50] sm:$0xff]  ;;  %v82_v22 = vld [vmem:[%s583_s3 + $0x28] sm:$0xff]  ;;  %v72_v44 = vsub.s32 3, %v35_v36 }
   0x7   :  { %47 = vperm.xlu0 %384, %v26_v1   ;;  %67 = vperm.xlu1 %386, %v26_v1   ;;  %v180_v23 = vld [vmem:[%s584_s5 + $0x48] sm:$0xff]  ;;  %v81_v24 = vld [vmem:[%s583_s3 + $0x20] sm:$0xff]  ;;  %v80_v26 = vld [vmem:[%s583_s3 + $0x18] sm:$0xff] }
   0x8   :  { %310 = vmatpush3.msra.mxu0 %v91_v5  ;;  %343 = vmatpush3.msra.mxu1 %v186_v12  ;;  %v179_v25 = vld [vmem:[%s584_s5 + $0x40] sm:$0xff]  ;;  %v178_v27 = vld [vmem:[%s584_s5 + $0x38] sm:$0xff]  ;;  %v79_v28 = vld [vmem:[%s583_s3 + $0x10] sm:$0xff] }
   0x9   :  { %311 = vmatprep.subr.mxu0 %v390_v4  ;;  %344 = vmatprep.subr.mxu1 %v390_v4  ;;  %v177_v29 = vld [vmem:[%s584_s5 + $0x30] sm:$0xff]  ;;  %v78_v30 = vld [vmem:[%s583_s3 + $0x8] sm:$0xff]  ;;  %v77_v32 = vld [vmem:[%s583_s3] sm:$0xff] }
   0xa   :  { %312 = vmatpush3.msra.mxu0 %v90_v8  ;;  %345 = vmatpush3.msra.mxu1 %v185_v13  ;;  %v176_v31 = vld [vmem:[%s584_s5 + $0x28] sm:$0xff]  ;;  %v175_v33 = vld [vmem:[%s584_s5 + $0x20] sm:$0xff]  ;;  %v174_v34 = vld [vmem:[%s584_s5 + $0x18] sm:$0xff] }
   0xb   :  { %313 = vmatprep.subr.mxu0 %v390_v4  ;;  %387 = vset.pattern.permute.xlu0 %v392_v7  ;;  %v27_v38 = vld [vmem:[%s585_s1] sm:$0xf]  ;;  %v173_v60 = vld [vmem:[%s584_s5 + $0x10] sm:$0xff]  ;;  %v172_v61 = vld [vmem:[%s584_s5 + $0x8] sm:$0xff] }
   0xc   :  { %314 = vmatpush3.msra.mxu0 %v89_v9  ;;  %346 = vmatprep.subr.mxu1 %v390_v4  ;;  %v37_v39 = vrot.slane %v27_v38, %v36_v37  ;;  %v53_v46 = vrot.slane %v27_v38, %v52_v40  ;;  %v270_v47 = vld [vmem:[%s586_s2] ss:$0 sm:$0xff]  ;;  %v63_v48 = vrot.slane %v27_v38, %v62_v42 }
   0xd   :  { %315 = vmatprep.subr.mxu0 %v390_v4  ;;  %347 = vmatpush3.msra.mxu1 %v184_v15  ;;  %v73_v49 = vrot.slane %v27_v38, %v72_v44  ;;  %v171_v62 = vld [vmem:[%s584_s5] sm:$0xff] }
   0xe   :  { %316 = vmatpush3.msra.mxu0 %v88_v10  ;;  %348 = vmatprep.subr.mxu1 %v390_v4  ;;  %v271_v63 = vld [vmem:[%s587_s4] ss:$0 sm:$0xff] }
   0xf   :  { %317 = vmatprep.subr.mxu0 %v390_v4  ;;  %349 = vmatpush3.msra.mxu1 %v183_v17  ;;  %v272_v5 = vld [vmem:[%s588_s6] ss:$0 sm:$0xff] }
  0x10   :  { %318 = vmatpush3.msra.mxu0 %v87_v11  ;;  %350 = vmatprep.subr.mxu1 %v390_v4 }
  0x11   :  { %319 = vmatprep.subr.mxu0 %v390_v4  ;;  %351 = vmatpush3.msra.mxu1 %v182_v19 }
  0x12   :  { %320 = vmatpush3.msra.mxu0 %v86_v14  ;;  %352 = vmatprep.subr.mxu1 %v390_v4 }
  0x13   :  { %321 = vmatprep.subr.mxu0 %v390_v4  ;;  %353 = vmatpush3.msra.mxu1 %v181_v21 }
  0x14   :  { %322 = vmatpush3.msra.mxu0 %v85_v16  ;;  %354 = vmatprep.subr.mxu1 %v390_v4 }
  0x15   :  { %323 = vmatprep.subr.mxu0 %v390_v4  ;;  %355 = vmatpush3.msra.mxu1 %v180_v23 }
  0x16   :  { %324 = vmatpush3.msra.mxu0 %v84_v18  ;;  %356 = vmatprep.subr.mxu1 %v390_v4 }
  0x17   :  { %325 = vmatprep.subr.mxu0 %v390_v4  ;;  %357 = vmatpush3.msra.mxu1 %v179_v25 }
  0x18   :  { %326 = vmatpush3.msra.mxu0 %v83_v20  ;;  %358 = vmatprep.subr.mxu1 %v390_v4 }
  0x19   :  { %327 = vmatprep.subr.mxu0 %v390_v4  ;;  %359 = vmatpush3.msra.mxu1 %v178_v27 }
  0x1a   :  { %328 = vmatpush3.msra.mxu0 %v82_v22  ;;  %360 = vmatprep.subr.mxu1 %v390_v4 }
  0x1b   :  { %329 = vmatprep.subr.mxu0 %v390_v4  ;;  %361 = vmatpush3.msra.mxu1 %v177_v29 }
  0x1c   :  { %330 = vmatpush3.msra.mxu0 %v81_v24  ;;  %362 = vmatprep.subr.mxu1 %v390_v4 }
  0x1d   :  { %331 = vmatprep.subr.mxu0 %v390_v4  ;;  %363 = vmatpush3.msra.mxu1 %v176_v31 }
  0x1e   :  { %332 = vmatpush3.msra.mxu0 %v80_v26  ;;  %364 = vmatprep.subr.mxu1 %v390_v4 }
  0x1f   :  { %333 = vmatprep.subr.mxu0 %v390_v4  ;;  %365 = vmatpush3.msra.mxu1 %v175_v33 }
  0x20   :  { %334 = vmatpush3.msra.mxu0 %v79_v28  ;;  %366 = vmatprep.subr.mxu1 %v390_v4 }
  0x21   :  { %335 = vmatprep.subr.mxu0 %v390_v4  ;;  %367 = vmatpush3.msra.mxu1 %v174_v34 }
  0x22   :  { %336 = vmatpush3.msra.mxu0 %v78_v30  ;;  %368 = vmatprep.subr.mxu1 %v390_v4 }
  0x23   :  { %337 = vmatprep.subr.mxu0 %v390_v4  ;;  %369 = vmatpush3.msra.mxu1 %v173_v60 }
  0x24   :  { %338 = vmatpush3.msra.mxu0 %v77_v32  ;;  %370 = vmatprep.subr.mxu1 %v390_v4 }
  0x25   :  { %371 = vmatpush3.msra.mxu1 %v172_v61 }
  0x26   :  { %372 = vmatprep.subr.mxu1 %v390_v4 }
  0x27   :  { %373 = vmatpush3.msra.mxu1 %v171_v62 }
  0x7d   :  { %v32_v41 = vpop.permute.xlu0 %31  ;;  %v58_v43 = vpop.permute.xlu1 %57 }
  0x7e   :  { %v38_v45 = vmul.f32 %v37_v39, %v32_v41  ;;  %v64_v54 = vmul.f32 %v63_v48, %v58_v43 }
  0x80   :  { %v45_v52 = vadd.f32 %v270_v47, %v38_v45 }
  0x82   :  { %v48_v50 = vpop.permute.xlu0 %47  ;;  %v68_v51 = vpop.permute.xlu1 %67 }
  0x83   :  { %v54_v53 = vmul.f32 %v53_v46, %v48_v50  ;;  %v74_v56 = vmul.f32 %v73_v49, %v68_v51 }
  0x85   :  { %v55_v55 = vadd.f32 %v54_v53, %v45_v52 }
  0x87   :  { %v65_v57 = vadd.f32 %v64_v54, %v55_v55 }
  0x89   :  { %v75_v58 = vadd.f32 %v74_v56, %v65_v57 }
  0x8b   :  { %v76_v59 = vmax.f32 %v75_v58, 0.0 }
  0x8d   :  { %340 = vmatmul.mubr.f32.vlgmr.msra.gmra.mxu0 %v76_v59 }
 0x14d   :  { %v166_v0 = vpop.f32.mrf.mxu0 }
 0x14e   :  { %v167_v1 = vadd.f32 %v271_v63, %v166_v0 }
 0x14f   :  { %v341_v2 = vpop.f32.mrf.mxu0 }
 0x150   :  { %v170_v3 = vmax.f32 %v167_v1, 0.0 }
 0x152   :  { %375 = vmatmul.mubr.f32.vlgmr.msra.gmra.mxu1 %v170_v3 }
 0x212   :  { %v260_v6 = vpop.f32.mrf.mxu1 }
 0x213   :  { %v261_v4 = vadd.f32 %v272_v5, %v260_v6 }
 0x214   :  { %v376_v7 = vpop.f32.mrf.mxu1 }
 0x215   :  { %265 = vst.msk [vmem:[%s589_s7] sm:$0xff] %vm264_vm1, %v261_v4 }

</bundles_post_ra>
